<compile_context>
chip_gen: v5e
topology: v5e:2x2
jax: 0.10.0
libtpu: 0.0.40
codegen_flags: <defaults>
</compile_context>

<pallas_src>
import functools

import jax
import jax.numpy as jnp
from jax.experimental import pallas as pl
from jax.experimental.pallas import tpu as pltpu

_NEG_BIG = -1e30          # finite "minus infinity" for padded class logits (f32-safe)
_CLASS_PAD = 128          # lane-dense padded class width
_TILE_B_HARD_CAP = 2048   # rows per batch tile (>= the 85%-of-roofline regime)


def _round_up(v, m):
    return ((v + m - 1) // m) * m


# --------------------------------------------------------------------------- #
# Kernel: fused 5-layer MLP + log_softmax over one batch tile.
# bf16 operands on the MXU, f32 accumulation.  x arrives as f32 and is cast
# in-kernel.  Classes padded to 128 lanes with a -1e30 bias (exp == 0 in f32).
# --------------------------------------------------------------------------- #
def _mlp_kernel(x_ref,
                w1_ref, b1_ref,
                w2_ref, b2_ref,
                w3_ref, b3_ref,
                w4_ref, b4_ref,
                w5_ref, b5_ref,
                o_ref):
    x = x_ref[...].astype(jnp.bfloat16)                             # f32 -> bf16 on VPU

    # fc1 + relu
    h = jnp.dot(x, w1_ref[...], preferred_element_type=jnp.float32) + b1_ref[...]
    h = jnp.maximum(h, 0.0).astype(jnp.bfloat16)

    # fc2 + relu
    h = jnp.dot(h, w2_ref[...], preferred_element_type=jnp.float32) + b2_ref[...]
    h = jnp.maximum(h, 0.0).astype(jnp.bfloat16)

    # fc3 + relu (+ dropout: identity in eval mode)
    h = jnp.dot(h, w3_ref[...], preferred_element_type=jnp.float32) + b3_ref[...]
    h = jnp.maximum(h, 0.0).astype(jnp.bfloat16)

    # fc4 + relu (+ dropout: identity in eval mode)
    h = jnp.dot(h, w4_ref[...], preferred_element_type=jnp.float32) + b4_ref[...]
    h = jnp.maximum(h, 0.0).astype(jnp.bfloat16)

    # fc5 (padded to 128 lanes; padded bias = -1e30 -> exp == 0 in f32)
    z = jnp.dot(h, w5_ref[...], preferred_element_type=jnp.float32) + b5_ref[...]

    # numerically stable log_softmax over the class axis (f32), store bf16
    m = jnp.max(z, axis=-1, keepdims=True)
    s = z - m
    lse = jnp.log(jnp.sum(jnp.exp(s), axis=-1, keepdims=True))
    o_ref[...] = (s - lse).astype(o_ref.dtype)


# --------------------------------------------------------------------------- #
# Tiling helpers
# --------------------------------------------------------------------------- #
def _vmem_budget_bytes():
    """Per-generation VMEM budget (v7x: ~48 MiB of 64; v5e/v6e: ~96 MiB of 128)."""
    try:
        cap = int(pltpu.get_tpu_info().vmem_capacity_bytes)
    except Exception:
        cap = 64 * 1024 * 1024          # conservative fallback (v7x per-TC)
    return min((cap * 3) // 4, 100 * 1024 * 1024)


def _pick_tile_b(padded_B, tile_cap):
    """Pick a multiple-of-8 divisor of padded_B within the VMEM cap.

    Prefers >=2 grid steps (megacore on v7x) while keeping tiles large enough
    (>=512, else >=128 rows) to amortize the ~0.35us per-grid-step overhead.
    """
    if padded_B % 8 != 0:               # only when B < 8: single full-array block
        return padded_B
    m = padded_B // 8
    divs, d = set(), 1
    while d * d <= m:
        if m % d == 0:
            divs.add(8 * d)
            divs.add(8 * (m // d))
        d += 1
    fitting = sorted(t for t in divs if t <= tile_cap)
    if not fitting:
        return 8                        # TODO(synk): K-tile over D for very large D
    multi = [t for t in fitting if padded_B // t >= 2]
    big = [t for t in multi if t >= 1024]
    if big:
        return big[0]                   # smallest >=1024-row tile -> most parallel steps
    mid = [t for t in multi if t >= 128]
    if mid:
        return mid[-1]                  # largest tile with >=2 steps
    return fitting[-1]                  # tiny batch: single step


# --------------------------------------------------------------------------- #
# Forward
# --------------------------------------------------------------------------- #
@functools.partial(jax.jit, static_argnames=("n_classes",))
def _forward_impl(x, weights, biases, *, n_classes):
    B = x.shape[0]
    x2d = x.reshape(B, -1)                      # x.view(x.size(0), -1), stays f32
    D = x2d.shape[1]
    w1, w2, w3, w4, w5p = weights
    b1, b2, b3, b4, b5p = biases

    # ---- batch alignment (no full-array pad in the common cases) ----
    padded_B = B if B < 8 else _round_up(B, 8)
    if padded_B != B:
        # TODO(synk): <=7-row tail pad still copies x; a masked tail tile would avoid it.
        x2d = jnp.pad(x2d, ((0, padded_B - B), (0, 0)))

    # ---- per-generation VMEM budget -> batch tile ----
    budget = _vmem_budget_bytes()
    resident = (2 * sum(2 * w.shape[0] * w.shape[1] for w in weights)   # bf16, dbl-buf
                + 2 * sum(4 * b.shape[1] for b in biases))              # f32, dbl-buf
    per_row = 2 * 4 * D + 2 * 2 * _CLASS_PAD + 2048   # dbl-buf f32 x + bf16 out + temps
    tile_cap = (budget - resident - (2 << 20)) // per_row
    tile_cap = max(8, min(_TILE_B_HARD_CAP, (tile_cap // 8) * 8))
    tile_b = _pick_tile_b(padded_B, tile_cap)
    n_steps = padded_B // tile_b

    # ---- cost estimate reflecting real traffic (f32 x, bf16 weights/out) ----
    layer_dims = [(w.shape[0], w.shape[1]) for w in weights]
    flops = 2 * padded_B * sum(k * n for k, n in layer_dims)
    bytes_accessed = (padded_B * D * 4
                      + sum(k * n * 2 for k, n in layer_dims)
                      + sum(4 * b.shape[1] for b in biases)
                      + padded_B * _CLASS_PAD * 2)
    cost = pl.CostEstimate(flops=flops,
                           transcendentals=padded_B * _CLASS_PAD,
                           bytes_accessed=bytes_accessed)

    # ---- specs: x batch-tiled, weights/biases VMEM-resident across the grid ----
    resident_map = lambda i: (0, 0)
    in_specs = [pl.BlockSpec((tile_b, D), lambda i: (i, 0))]
    for w, b in zip(weights, biases):
        in_specs.append(pl.BlockSpec(w.shape, resident_map))
        in_specs.append(pl.BlockSpec(b.shape, resident_map))

    out = pl.pallas_call(
        _mlp_kernel,
        out_shape=jax.ShapeDtypeStruct((padded_B, _CLASS_PAD), jnp.bfloat16),
        grid=(n_steps,),
        in_specs=in_specs,
        out_specs=pl.BlockSpec((tile_b, _CLASS_PAD), lambda i: (i, 0)),
        compiler_params=pltpu.CompilerParams(
            dimension_semantics=("parallel",),      # shards batch tiles across TCs on v7x
            vmem_limit_bytes=int(budget)),
        cost_estimate=cost,
    )(x2d, w1, b1, w2, b2, w3, b3, w4, b4, w5p, b5p)

    return out[:B, :n_classes].astype(jnp.float32)


def prepare_params(params):
    """One-time prep (kept out of the per-call jit path): pad fc5 to a
    lane-dense 128-wide output and cast weights to bf16 / biases to f32."""
    (w1, b1), (w2, b2), (w3, b3), (w4, b4), (w5, b5) = params
    n_classes = int(w5.shape[1])
    w5p = jnp.zeros((w5.shape[0], _CLASS_PAD), w5.dtype).at[:, :n_classes].set(w5)
    b5p = jnp.full((1, _CLASS_PAD), _NEG_BIG, jnp.float32).at[:, :n_classes].set(b5)
    weights = tuple(w.astype(jnp.bfloat16) for w in (w1, w2, w3, w4, w5p))
    biases = tuple(b.astype(jnp.float32) for b in (b1, b2, b3, b4)) + (b5p,)
    return {"weights": weights, "biases": biases, "n_classes": n_classes}


def baseline_forward(x, prepared):
    """x: [B, C, H, W] float32 (NCHW). Returns [B, 3] log-probs (f32)."""
    return _forward_impl(x, prepared["weights"], prepared["biases"],
                         n_classes=prepared["n_classes"])


def init_params(key, input_dim):
    """PyTorch-style uniform(+/- 1/sqrt(fan_in)) init.

    Output widths follow the module (64, 64, 128, 64, 3); input widths are
    chained so the forward composes.
    """
    dims = [(input_dim, 64), (64, 64), (64, 128), (128, 64), (64, 3)]
    params = []
    for i, (fan_in, fan_out) in enumerate(dims):
        kw, kb = jax.random.split(jax.random.fold_in(key, i))
        bound = 1.0 / jnp.sqrt(jnp.float32(fan_in))
        w = jax.random.uniform(kw, (fan_in, fan_out), jnp.float32, -bound, bound)
        b = jax.random.uniform(kb, (1, fan_out), jnp.float32, -bound, bound)
        params.append((w, b))
    return params


def _reference_forward(x, params):
    """Pure-JAX reference mirroring the kernel's bf16/f32 mixed precision."""
    h = x.reshape(x.shape[0], -1).astype(jnp.bfloat16)
    for i, (w, b) in enumerate(params):
        h = jnp.dot(h, w.astype(jnp.bfloat16),
                    preferred_element_type=jnp.float32) + b
        if i < len(params) - 1:
            h = jnp.maximum(h, 0.0).astype(jnp.bfloat16)
    return jax.nn.log_softmax(h, axis=1)


if __name__ == "__main__":
    key = jax.random.PRNGKey(0)
    kx, kp = jax.random.split(key)

    B, C, H, W = 2, 4, 16, 16          # small NCHW input -> input_dim = 1024
    x = jax.random.normal(kx, (B, C, H, W), jnp.float32)
    params = init_params(kp, C * H * W)
    prepared = prepare_params(params)

    out = baseline_forward(x, prepared)
    out = jax.block_until_ready(out)

    ref = _reference_forward(x, params)
    assert out.shape == (B, 3)
    assert jnp.allclose(out, ref, atol=2e-2, rtol=2e-2), "mismatch vs reference"
    # rows of log-probs should exp-sum to ~1 (bf16 output rounding tolerated)
    assert jnp.allclose(jnp.exp(out).sum(axis=1), 1.0, atol=1.5e-2)

    print("KERNEL_OK")
</pallas_src>

<mosaic_0001>
module attributes {stable_mosaic.version = 11 : i64} {
  func.func @_mlp_kernel(%arg0: i32, %arg1: memref<2x1024xf32, #tpu.memory_space<vmem>>, %arg2: memref<1024x64xbf16, #tpu.memory_space<vmem>>, %arg3: memref<1x64xf32, #tpu.memory_space<vmem>>, %arg4: memref<64x64xbf16, #tpu.memory_space<vmem>>, %arg5: memref<1x64xf32, #tpu.memory_space<vmem>>, %arg6: memref<64x128xbf16, #tpu.memory_space<vmem>>, %arg7: memref<1x128xf32, #tpu.memory_space<vmem>>, %arg8: memref<128x64xbf16, #tpu.memory_space<vmem>>, %arg9: memref<1x64xf32, #tpu.memory_space<vmem>>, %arg10: memref<64x128xbf16, #tpu.memory_space<vmem>>, %arg11: memref<1x128xf32, #tpu.memory_space<vmem>>, %arg12: memref<2x128xbf16, #tpu.memory_space<vmem>>) attributes {dimension_semantics = [#tpu.dimension_semantics<parallel>], iteration_bounds = array<i64: 1>, scalar_prefetch = 0 : i64, scratch_operands = 0 : i64, tpu.core_type = #tpu.core_type<tc>, window_params = [{transform_indices = @transform_0, window_bounds = array<i64: 2, 1024>}, {pipeline_mode = #tpu.pipeline_mode<synchronous>, transform_indices = @transform_1, window_bounds = array<i64: 1024, 64>}, {pipeline_mode = #tpu.pipeline_mode<synchronous>, transform_indices = @transform_2, window_bounds = array<i64: 1, 64>}, {pipeline_mode = #tpu.pipeline_mode<synchronous>, transform_indices = @transform_3, window_bounds = array<i64: 64, 64>}, {pipeline_mode = #tpu.pipeline_mode<synchronous>, transform_indices = @transform_4, window_bounds = array<i64: 1, 64>}, {pipeline_mode = #tpu.pipeline_mode<synchronous>, transform_indices = @transform_5, window_bounds = array<i64: 64, 128>}, {pipeline_mode = #tpu.pipeline_mode<synchronous>, transform_indices = @transform_6, window_bounds = array<i64: 1, 128>}, {pipeline_mode = #tpu.pipeline_mode<synchronous>, transform_indices = @transform_7, window_bounds = array<i64: 128, 64>}, {pipeline_mode = #tpu.pipeline_mode<synchronous>, transform_indices = @transform_8, window_bounds = array<i64: 1, 64>}, {pipeline_mode = #tpu.pipeline_mode<synchronous>, transform_indices = @transform_9, window_bounds = array<i64: 64, 128>}, {pipeline_mode = #tpu.pipeline_mode<synchronous>, transform_indices = @transform_10, window_bounds = array<i64: 1, 128>}, {transform_indices = @transform_11, window_bounds = array<i64: 2, 128>}]} {
    %c0 = arith.constant 0 : index
    %c0_0 = arith.constant 0 : index
    %0 = vector.load %arg1[%c0, %c0_0] : memref<2x1024xf32, #tpu.memory_space<vmem>>, vector<2x1024xf32>
    %1 = arith.truncf %0 : vector<2x1024xf32> to vector<2x1024xbf16>
    %c0_1 = arith.constant 0 : index
    %c0_2 = arith.constant 0 : index
    %2 = vector.load %arg2[%c0_1, %c0_2] : memref<1024x64xbf16, #tpu.memory_space<vmem>>, vector<1024x64xbf16>
    %cst = arith.constant dense<0.000000e+00> : vector<2x64xf32>
    %3 = tpu.matmul %1, %2, %cst {dimension_numbers = #tpu.dot_dimension_numbers<[1], [0], [0], [1], [0, 0, 1, 1], [], []>} : vector<2x1024xbf16>, vector<1024x64xbf16>, vector<2x64xf32> -> vector<2x64xf32>
    %c0_3 = arith.constant 0 : index
    %c0_4 = arith.constant 0 : index
    %4 = vector.load %arg3[%c0_3, %c0_4] : memref<1x64xf32, #tpu.memory_space<vmem>>, vector<1x64xf32>
    %5 = vector.broadcast %4 : vector<1x64xf32> to vector<2x64xf32>
    %6 = arith.addf %3, %5 : vector<2x64xf32>
    %cst_5 = arith.constant 0.000000e+00 : f32
    %7 = vector.broadcast %cst_5 : f32 to vector<2x64xf32>
    %8 = arith.maximumf %6, %7 : vector<2x64xf32>
    %9 = arith.truncf %8 : vector<2x64xf32> to vector<2x64xbf16>
    %c0_6 = arith.constant 0 : index
    %c0_7 = arith.constant 0 : index
    %10 = vector.load %arg4[%c0_6, %c0_7] : memref<64x64xbf16, #tpu.memory_space<vmem>>, vector<64x64xbf16>
    %cst_8 = arith.constant dense<0.000000e+00> : vector<2x64xf32>
    %11 = tpu.matmul %9, %10, %cst_8 {dimension_numbers = #tpu.dot_dimension_numbers<[1], [0], [0], [1], [0, 0, 1, 1], [], []>} : vector<2x64xbf16>, vector<64x64xbf16>, vector<2x64xf32> -> vector<2x64xf32>
    %c0_9 = arith.constant 0 : index
    %c0_10 = arith.constant 0 : index
    %12 = vector.load %arg5[%c0_9, %c0_10] : memref<1x64xf32, #tpu.memory_space<vmem>>, vector<1x64xf32>
    %13 = vector.broadcast %12 : vector<1x64xf32> to vector<2x64xf32>
    %14 = arith.addf %11, %13 : vector<2x64xf32>
    %cst_11 = arith.constant 0.000000e+00 : f32
    %15 = vector.broadcast %cst_11 : f32 to vector<2x64xf32>
    %16 = arith.maximumf %14, %15 : vector<2x64xf32>
    %17 = arith.truncf %16 : vector<2x64xf32> to vector<2x64xbf16>
    %c0_12 = arith.constant 0 : index
    %c0_13 = arith.constant 0 : index
    %18 = vector.load %arg6[%c0_12, %c0_13] : memref<64x128xbf16, #tpu.memory_space<vmem>>, vector<64x128xbf16>
    %cst_14 = arith.constant dense<0.000000e+00> : vector<2x128xf32>
    %19 = tpu.matmul %17, %18, %cst_14 {dimension_numbers = #tpu.dot_dimension_numbers<[1], [0], [0], [1], [0, 0, 1, 1], [], []>} : vector<2x64xbf16>, vector<64x128xbf16>, vector<2x128xf32> -> vector<2x128xf32>
    %c0_15 = arith.constant 0 : index
    %c0_16 = arith.constant 0 : index
    %20 = vector.load %arg7[%c0_15, %c0_16] : memref<1x128xf32, #tpu.memory_space<vmem>>, vector<1x128xf32>
    %21 = vector.broadcast %20 : vector<1x128xf32> to vector<2x128xf32>
    %22 = arith.addf %19, %21 : vector<2x128xf32>
    %cst_17 = arith.constant 0.000000e+00 : f32
    %23 = vector.broadcast %cst_17 : f32 to vector<2x128xf32>
    %24 = arith.maximumf %22, %23 : vector<2x128xf32>
    %25 = arith.truncf %24 : vector<2x128xf32> to vector<2x128xbf16>
    %c0_18 = arith.constant 0 : index
    %c0_19 = arith.constant 0 : index
    %26 = vector.load %arg8[%c0_18, %c0_19] : memref<128x64xbf16, #tpu.memory_space<vmem>>, vector<128x64xbf16>
    %cst_20 = arith.constant dense<0.000000e+00> : vector<2x64xf32>
    %27 = tpu.matmul %25, %26, %cst_20 {dimension_numbers = #tpu.dot_dimension_numbers<[1], [0], [0], [1], [0, 0, 1, 1], [], []>} : vector<2x128xbf16>, vector<128x64xbf16>, vector<2x64xf32> -> vector<2x64xf32>
    %c0_21 = arith.constant 0 : index
    %c0_22 = arith.constant 0 : index
    %28 = vector.load %arg9[%c0_21, %c0_22] : memref<1x64xf32, #tpu.memory_space<vmem>>, vector<1x64xf32>
    %29 = vector.broadcast %28 : vector<1x64xf32> to vector<2x64xf32>
    %30 = arith.addf %27, %29 : vector<2x64xf32>
    %cst_23 = arith.constant 0.000000e+00 : f32
    %31 = vector.broadcast %cst_23 : f32 to vector<2x64xf32>
    %32 = arith.maximumf %30, %31 : vector<2x64xf32>
    %33 = arith.truncf %32 : vector<2x64xf32> to vector<2x64xbf16>
    %c0_24 = arith.constant 0 : index
    %c0_25 = arith.constant 0 : index
    %34 = vector.load %arg10[%c0_24, %c0_25] : memref<64x128xbf16, #tpu.memory_space<vmem>>, vector<64x128xbf16>
    %cst_26 = arith.constant dense<0.000000e+00> : vector<2x128xf32>
    %35 = tpu.matmul %33, %34, %cst_26 {dimension_numbers = #tpu.dot_dimension_numbers<[1], [0], [0], [1], [0, 0, 1, 1], [], []>} : vector<2x64xbf16>, vector<64x128xbf16>, vector<2x128xf32> -> vector<2x128xf32>
    %c0_27 = arith.constant 0 : index
    %c0_28 = arith.constant 0 : index
    %36 = vector.load %arg11[%c0_27, %c0_28] : memref<1x128xf32, #tpu.memory_space<vmem>>, vector<1x128xf32>
    %37 = vector.broadcast %36 : vector<1x128xf32> to vector<2x128xf32>
    %38 = arith.addf %35, %37 : vector<2x128xf32>
    %cst_29 = arith.constant dense<0xFF800000> : vector<2xf32>
    %39 = vector.multi_reduction <maximumf>, %38, %cst_29 [1] : vector<2x128xf32> to vector<2xf32>
    %40 = vector.shape_cast %39 : vector<2xf32> to vector<2x1xf32>
    %41 = vector.broadcast %40 : vector<2x1xf32> to vector<2x128xf32>
    %42 = arith.subf %38, %41 : vector<2x128xf32>
    %43 = math.exp %42 : vector<2x128xf32>
    %cst_30 = arith.constant dense<0.000000e+00> : vector<2xf32>
    %44 = vector.multi_reduction <add>, %43, %cst_30 [1] : vector<2x128xf32> to vector<2xf32>
    %45 = vector.shape_cast %44 : vector<2xf32> to vector<2x1xf32>
    %46 = math.log %45 : vector<2x1xf32>
    %47 = vector.broadcast %46 : vector<2x1xf32> to vector<2x128xf32>
    %48 = arith.subf %42, %47 : vector<2x128xf32>
    %49 = arith.truncf %48 : vector<2x128xf32> to vector<2x128xbf16>
    %c0_31 = arith.constant 0 : index
    %c0_32 = arith.constant 0 : index
    %50 = vector.load %arg12[%c0_31, %c0_32] : memref<2x128xbf16, #tpu.memory_space<vmem>>, vector<2x128xbf16>
    tpu.vector_store %arg12[%c0_31, %c0_32], %49 {strides = array<i32>} : memref<2x128xbf16, #tpu.memory_space<vmem>>, vector<2x128xbf16>,
    return
  }
  func.func @transform_0(%arg0: i32) -> (i32, i32) {
    %c0_i32 = arith.constant 0 : i32
    %c0_i32_0 = arith.constant 0 : i32
    return %arg0, %c0_i32 : i32, i32
  }
  func.func @transform_1(%arg0: i32) -> (i32, i32) {
    %c0_i32 = arith.constant 0 : i32
    %c0_i32_0 = arith.constant 0 : i32
    %c0_i32_1 = arith.constant 0 : i32
    return %c0_i32, %c0_i32_0 : i32, i32
  }
  func.func @transform_2(%arg0: i32) -> (i32, i32) {
    %c0_i32 = arith.constant 0 : i32
    %c0_i32_0 = arith.constant 0 : i32
    %c0_i32_1 = arith.constant 0 : i32
    return %c0_i32, %c0_i32_0 : i32, i32
  }
  func.func @transform_3(%arg0: i32) -> (i32, i32) {
    %c0_i32 = arith.constant 0 : i32
    %c0_i32_0 = arith.constant 0 : i32
    %c0_i32_1 = arith.constant 0 : i32
    return %c0_i32, %c0_i32_0 : i32, i32
  }
  func.func @transform_4(%arg0: i32) -> (i32, i32) {
    %c0_i32 = arith.constant 0 : i32
    %c0_i32_0 = arith.constant 0 : i32
    %c0_i32_1 = arith.constant 0 : i32
    return %c0_i32, %c0_i32_0 : i32, i32
  }
  func.func @transform_5(%arg0: i32) -> (i32, i32) {
    %c0_i32 = arith.constant 0 : i32
    %c0_i32_0 = arith.constant 0 : i32
    %c0_i32_1 = arith.constant 0 : i32
    return %c0_i32, %c0_i32_0 : i32, i32
  }
  func.func @transform_6(%arg0: i32) -> (i32, i32) {
    %c0_i32 = arith.constant 0 : i32
    %c0_i32_0 = arith.constant 0 : i32
    %c0_i32_1 = arith.constant 0 : i32
    return %c0_i32, %c0_i32_0 : i32, i32
  }
  func.func @transform_7(%arg0: i32) -> (i32, i32) {
    %c0_i32 = arith.constant 0 : i32
    %c0_i32_0 = arith.constant 0 : i32
    %c0_i32_1 = arith.constant 0 : i32
    return %c0_i32, %c0_i32_0 : i32, i32
  }
  func.func @transform_8(%arg0: i32) -> (i32, i32) {
    %c0_i32 = arith.constant 0 : i32
    %c0_i32_0 = arith.constant 0 : i32
    %c0_i32_1 = arith.constant 0 : i32
    return %c0_i32, %c0_i32_0 : i32, i32
  }
  func.func @transform_9(%arg0: i32) -> (i32, i32) {
    %c0_i32 = arith.constant 0 : i32
    %c0_i32_0 = arith.constant 0 : i32
    %c0_i32_1 = arith.constant 0 : i32
    return %c0_i32, %c0_i32_0 : i32, i32
  }
  func.func @transform_10(%arg0: i32) -> (i32, i32) {
    %c0_i32 = arith.constant 0 : i32
    %c0_i32_0 = arith.constant 0 : i32
    %c0_i32_1 = arith.constant 0 : i32
    return %c0_i32, %c0_i32_0 : i32, i32
  }
  func.func @transform_11(%arg0: i32) -> (i32, i32) {
    %c0_i32 = arith.constant 0 : i32
    %c0_i32_0 = arith.constant 0 : i32
    return %arg0, %c0_i32 : i32, i32
  }
}

</mosaic_0001>

<bundles_post_ra>
// kernel: _forward_impl.1
= control target key start
LH: loop header
LB: loop body
LE: loop exit
PB: predicated region body
PF: predicated region fallthrough
CT: control target
= control target key end

     0   :  { %vm728_vm0 = vcmask 523264   ;;  %vm936_vm1 = vcmask 1041408   ;;  %s1726_s1 = inlined_call_operand.vmem [shape: bf16[1024,64], index: 1, kind: input, shape index: {}]   ;;  %s1727_s0 = inlined_call_operand.vmem [shape: f32[2,1024], index: 0, kind: input, shape index: {}]   ;;  %s1728_s2 = inlined_call_operand.vmem [shape: f32[1,64], index: 2, kind: input, shape index: {}]   ;;  %s1729_s4 = inlined_call_operand.vmem [shape: f32[1,64], index: 4, kind: input, shape index: {}]   ;;  %s1730_s3 = inlined_call_operand.vmem [shape: bf16[64,64], index: 3, kind: input, shape index: {}]   ;;  %s1731_s5 = inlined_call_operand.vmem [shape: bf16[64,128], index: 5, kind: input, shape index: {}]   ;;  %s1732_s6 = inlined_call_operand.vmem [shape: f32[1,128], index: 6, kind: input, shape index: {}]   ;;  %s1733_s7 = inlined_call_operand.vmem [shape: bf16[128,64], index: 7, kind: input, shape index: {}]   ;;  %s1734_s8 = inlined_call_operand.vmem [shape: f32[1,64], index: 8, kind: input, shape index: {}]   ;;  %s1735_s9 = inlined_call_operand.vmem [shape: bf16[64,128], index: 9, kind: input, shape index: {}]   ;;  %s1736_s10 = inlined_call_operand.vmem [shape: f32[1,128], index: 10, kind: input, shape index: {}]   ;;  %s1737_s11 = inlined_call_operand.vmem [shape: bf16[2,128], index: 11, kind: output, shape index: {}]  }
   0x1   :  { %v1301_v0 = vld [vmem:[%s1726_s1 + $0x38] sm:$0xff]  ;;  %v1300_v4 = vld [vmem:[%s1726_s1 + $0x30] sm:$0xff]  ;;  %v1299_v8 = vld [vmem:[%s1726_s1 + $0x28] sm:$0xff] }
   0x2   :  { %v1309_v1 = vld [vmem:[%s1726_s1 + $0x78] sm:$0xff]  ;;  %586 = vmatpush.bf16.msra.mxu0 %v1301_v0  ;;  %v1308_v5 = vld [vmem:[%s1726_s1 + $0x70] sm:$0xff]  ;;  %v1307_v9 = vld [vmem:[%s1726_s1 + $0x68] sm:$0xff] }
   0x3   :  { %v1317_v2 = vld [vmem:[%s1726_s1 + $0xb8] sm:$0xff]  ;;  %599 = vmatpush.bf16.msra.mxu1 %v1309_v1  ;;  %v1316_v6 = vld [vmem:[%s1726_s1 + $0xb0] sm:$0xff]  ;;  %v1315_v10 = vld [vmem:[%s1726_s1 + $0xa8] sm:$0xff] }
   0x4   :  { %v1325_v3 = vld [vmem:[%s1726_s1 + $0xf8] sm:$0xff]  ;;  %612 = vmatpush.bf16.msra.mxu2 %v1317_v2  ;;  %v1324_v7 = vld [vmem:[%s1726_s1 + $0xf0] sm:$0xff]  ;;  %v1323_v11 = vld [vmem:[%s1726_s1 + $0xe8] sm:$0xff] }
   0x5   :  { %625 = vmatpush.bf16.msra.mxu3 %v1325_v3  ;;  %v1298_v12 = vld [vmem:[%s1726_s1 + $0x20] sm:$0xff]  ;;  %v40_v17 = vld [vmem:[%s1727_s0 + $0x8] sm:$0xff]  ;;  %v1297_v18 = vld [vmem:[%s1726_s1 + $0x18] sm:$0xff] }
   0x6   :  { %587 = vmatpush.bf16.msra.mxu0 %v1300_v4  ;;  %v1306_v13 = vld [vmem:[%s1726_s1 + $0x60] sm:$0xff]  ;;  %v1305_v19 = vld [vmem:[%s1726_s1 + $0x58] sm:$0xff]  ;;  %45 = vst [vmem:[#allocation1 + $0x20] ss:$4 sm:$0xff] %v40_v17  ;;  %v1296_v22 = vld [vmem:[%s1726_s1 + $0x10] sm:$0xff] }
   0x7   :  { %600 = vmatpush.bf16.msra.mxu1 %v1308_v5  ;;  %v1314_v14 = vld [vmem:[%s1726_s1 + $0xa0] sm:$0xff]  ;;  %v1313_v20 = vld [vmem:[%s1726_s1 + $0x98] sm:$0xff]  ;;  %v1304_v23 = vld [vmem:[%s1726_s1 + $0x50] sm:$0xff] }
   0x8   :  { %613 = vmatpush.bf16.msra.mxu2 %v1316_v6  ;;  %v1322_v15 = vld [vmem:[%s1726_s1 + $0xe0] sm:$0xff]  ;;  %v1321_v21 = vld [vmem:[%s1726_s1 + $0xd8] sm:$0xff]  ;;  %v1312_v24 = vld [vmem:[%s1726_s1 + $0x90] sm:$0xff] }
   0x9   :  { %626 = vmatpush.bf16.msra.mxu3 %v1324_v7  ;;  %v39_v16 = vld [vmem:[%s1727_s0] sm:$0xff]  ;;  %v1320_v25 = vld [vmem:[%s1726_s1 + $0xd0] sm:$0xff]  ;;  %v1295_v26 = vld [vmem:[%s1726_s1 + $0x8] sm:$0xff] }
   0xa   :  { %588 = vmatpush.bf16.msra.mxu0 %v1299_v8  ;;  %43 = vst [vmem:[#allocation1] ss:$4 sm:$0xff] %v39_v16  ;;  %v1303_v27 = vld [vmem:[%s1726_s1 + $0x48] sm:$0xff]  ;;  %v1294_v30 = vld [vmem:[%s1726_s1] sm:$0xff]  ;;  %v1333_v34 = vld [vmem:[%s1726_s1 + $0x138] sm:$0xff] }
   0xb   :  { %601 = vmatpush.bf16.msra.mxu1 %v1307_v9  ;;  %v1311_v28 = vld [vmem:[%s1726_s1 + $0x88] sm:$0xff]  ;;  %v1302_v31 = vld [vmem:[%s1726_s1 + $0x40] sm:$0xff]  ;;  %v1341_v35 = vld [vmem:[%s1726_s1 + $0x178] sm:$0xff] }
   0xc   :  { %614 = vmatpush.bf16.msra.mxu2 %v1315_v10  ;;  %v1319_v29 = vld [vmem:[%s1726_s1 + $0xc8] sm:$0xff]  ;;  %v1310_v32 = vld [vmem:[%s1726_s1 + $0x80] sm:$0xff]  ;;  %v1349_v40 = vld [vmem:[%s1726_s1 + $0x1b8] sm:$0xff] }
   0xd   :  { %627 = vmatpush.bf16.msra.mxu3 %v1323_v11  ;;  %v1318_v33 = vld [vmem:[%s1726_s1 + $0xc0] sm:$0xff]  ;;  %v1357_v41 = vld [vmem:[%s1726_s1 + $0x1f8] sm:$0xff]  ;;  %v1332_v46 = vld [vmem:[%s1726_s1 + $0x130] sm:$0xff] }
   0xe   :  { %589 = vmatpush.bf16.msra.mxu0 %v1298_v12  ;;  %v1340_v47 = vld [vmem:[%s1726_s1 + $0x170] sm:$0xff]  ;;  %v1331_v50 = vld [vmem:[%s1726_s1 + $0x128] sm:$0xff]  ;;  %v1330_v54 = vld [vmem:[%s1726_s1 + $0x120] sm:$0xff] }
   0xf   :  { %602 = vmatpush.bf16.msra.mxu1 %v1306_v13  ;;  %v1348_v48 = vld [vmem:[%s1726_s1 + $0x1b0] sm:$0xff]  ;;  %v1339_v51 = vld [vmem:[%s1726_s1 + $0x168] sm:$0xff]  ;;  %v1338_v55 = vld [vmem:[%s1726_s1 + $0x160] sm:$0xff] }
  0x10   :  { %615 = vmatpush.bf16.msra.mxu2 %v1314_v14  ;;  %v1356_v49 = vld [vmem:[%s1726_s1 + $0x1f0] sm:$0xff]  ;;  %v1347_v52 = vld [vmem:[%s1726_s1 + $0x1a8] sm:$0xff]  ;;  %v1346_v56 = vld [vmem:[%s1726_s1 + $0x1a0] sm:$0xff] }
  0x11   :  { %628 = vmatpush.bf16.msra.mxu3 %v1322_v15  ;;  %v48_v36 = vld.sshfl [vmem:[#allocation1 + $0x10] sm:$0xff pattern:$0x73625140]  ;;  %v46_v37 = vld.sshfl [vmem:[#allocation1] sm:$0xff pattern:$0x73625140] }
  0x12   :  { %590 = vmatpush.bf16.msra.mxu0 %v1297_v18  ;;  %v49_v38 = vld.sshfl [vmem:[#allocation1 + $0x18] sm:$0xff pattern:$0x73625140]  ;;  %v47_v39 = vld.sshfl [vmem:[#allocation1 + $0x8] sm:$0xff pattern:$0x73625140]  ;;  %v64_v42 = vpack.c.bf16 %v48_v36, %v48_v36  ;;  %v62_v43 = vpack.c.bf16 %v46_v37, %v46_v37 }
  0x13   :  { %603 = vmatpush.bf16.msra.mxu1 %v1305_v19  ;;  %v65_v44 = vpack.c.bf16 %v49_v38, %v49_v38  ;;  %v63_v45 = vpack.c.bf16 %v47_v39, %v47_v39  ;;  %v1355_v53 = vld [vmem:[%s1726_s1 + $0x1e8] sm:$0xff]  ;;  %v1354_v57 = vld [vmem:[%s1726_s1 + $0x1e0] sm:$0xff]  ;;  %v1329_v58 = vld [vmem:[%s1726_s1 + $0x118] sm:$0xff] }
  0x14   :  { %616 = vmatpush.bf16.msra.mxu2 %v1313_v20  ;;  %v1337_v59 = vld [vmem:[%s1726_s1 + $0x158] sm:$0xff]  ;;  %v1328_v62 = vld [vmem:[%s1726_s1 + $0x110] sm:$0xff]  ;;  %v1327_v2 = vld [vmem:[%s1726_s1 + $0x108] sm:$0xff] }
  0x15   :  { %629 = vmatpush.bf16.msra.mxu3 %v1321_v21  ;;  %v1345_v60 = vld [vmem:[%s1726_s1 + $0x198] sm:$0xff]  ;;  %v1336_v63 = vld [vmem:[%s1726_s1 + $0x150] sm:$0xff]  ;;  %v1335_v3 = vld [vmem:[%s1726_s1 + $0x148] sm:$0xff] }
  0x16   :  { %591 = vmatpush.bf16.msra.mxu0 %v1296_v22  ;;  %v1353_v61 = vld [vmem:[%s1726_s1 + $0x1d8] sm:$0xff]  ;;  %v1344_v0 = vld [vmem:[%s1726_s1 + $0x190] sm:$0xff]  ;;  %v1343_v4 = vld [vmem:[%s1726_s1 + $0x188] sm:$0xff] }
  0x17   :  { %604 = vmatpush.bf16.msra.mxu1 %v1304_v23  ;;  %v1352_v1 = vld [vmem:[%s1726_s1 + $0x1d0] sm:$0xff]  ;;  %v1351_v5 = vld [vmem:[%s1726_s1 + $0x1c8] sm:$0xff]  ;;  %v1326_v6 = vld [vmem:[%s1726_s1 + $0x100] sm:$0xff] }
  0x18   :  { %617 = vmatpush.bf16.msra.mxu2 %v1312_v24  ;;  %v1334_v7 = vld [vmem:[%s1726_s1 + $0x140] sm:$0xff]  ;;  %v51_v11 = vld.sshfl [vmem:[#allocation1 + $0x28] sm:$0xff pattern:$0x73625140]  ;;  %v1361_v18 = vld [vmem:[%s1730_s3 + $0x18] sm:$0xff] }
  0x19   :  { %630 = vmatpush.bf16.msra.mxu3 %v1320_v25  ;;  %v1342_v8 = vld [vmem:[%s1726_s1 + $0x180] sm:$0xff]  ;;  %v52_v12 = vld.sshfl [vmem:[#allocation1 + $0x30] sm:$0xff pattern:$0x73625140]  ;;  %v67_v15 = vpack.c.bf16 %v51_v11, %v51_v11  ;;  %v1359_v22 = vld [vmem:[%s1730_s3 + $0x8] sm:$0xff] }
  0x1a   :  { %592 = vmatpush.bf16.msra.mxu0 %v1295_v26  ;;  %v1350_v9 = vld [vmem:[%s1726_s1 + $0x1c0] sm:$0xff]  ;;  %v53_v13 = vld.sshfl [vmem:[#allocation1 + $0x38] sm:$0xff pattern:$0x73625140]  ;;  %v68_v16 = vpack.c.bf16 %v52_v12, %v52_v12  ;;  %v1360_v20 = vld [vmem:[%s1730_s3 + $0x10] sm:$0xff] }
  0x1b   :  { %605 = vmatpush.bf16.msra.mxu1 %v1303_v27  ;;  %v50_v10 = vld.sshfl [vmem:[#allocation1 + $0x20] sm:$0xff pattern:$0x73625140]  ;;  %v69_v17 = vpack.c.bf16 %v53_v13, %v53_v13 }
  0x1c   :  { %618 = vmatpush.bf16.msra.mxu2 %v1311_v28  ;;  %v66_v14 = vpack.c.bf16 %v50_v10, %v50_v10  ;;  %v1358_v26 = vld [vmem:[%s1730_s3] sm:$0xff] }
  0x1d   :  { %631 = vmatpush.bf16.msra.mxu3 %v1319_v29  ;;  %v1378_v28 = vld [vmem:[%s1728_s2] ss:$0 sm:$0xff]  ;;  %v1365_v29 = vld [vmem:[%s1731_s5 + $0x18] sm:$0xff] }
  0x1e   :  { %593 = vmatpush.bf16.msra.mxu0 %v1294_v30  ;;  %v1374_v12 = vld [vmem:[%s1735_s9] sm:$0xff] }
  0x1f   :  { %606 = vmatpush.bf16.msra.mxu1 %v1302_v31  ;;  %v1381_v13 = vld [vmem:[%s1734_s8] ss:$0 sm:$0xff] }
  0x20   :  { %619 = vmatpush.bf16.msra.mxu2 %v1310_v32  ;;  %v1364_v32 = vld [vmem:[%s1731_s5 + $0x10] sm:$0xff] }
  0x21   :  { %632 = vmatpush.bf16.msra.mxu3 %v1318_v33  ;;  %594 = vmatmul.bf16.vlgmr.msra.gmra.mxu0 %v62_v43 }
  0x22   :  { %638 = vmatpush.bf16.msrb.mxu0 %v1333_v34  ;;  %607 = vmatmul.bf16.vlgmr.msra.gmra.mxu1 %v63_v45  ;;  %v1363_v34 = vld [vmem:[%s1731_s5 + $0x8] sm:$0xff] }
  0x23   :  { %651 = vmatpush.bf16.msrb.mxu1 %v1341_v35  ;;  %620 = vmatmul.bf16.vlgmr.msra.gmra.mxu2 %v64_v42 }
  0x24   :  { %664 = vmatpush.bf16.msrb.mxu2 %v1349_v40  ;;  %633 = vmatmul.bf16.vlgmr.msra.gmra.mxu3 %v65_v44 }
  0x25   :  { %677 = vmatpush.bf16.msrb.mxu3 %v1357_v41 }
  0x26   :  { %639 = vmatpush.bf16.msrb.mxu0 %v1332_v46 }
  0x27   :  { %652 = vmatpush.bf16.msrb.mxu1 %v1340_v47 }
  0x28   :  { %665 = vmatpush.bf16.msrb.mxu2 %v1348_v48 }
  0x29   :  { %678 = vmatpush.bf16.msrb.mxu3 %v1356_v49 }
  0x2a   :  { %640 = vmatpush.bf16.msrb.mxu0 %v1331_v50 }
  0x2b   :  { %653 = vmatpush.bf16.msrb.mxu1 %v1339_v51 }
  0x2c   :  { %666 = vmatpush.bf16.msrb.mxu2 %v1347_v52  ;;  %v1362_v52 = vld [vmem:[%s1731_s5] sm:$0xff] }
  0x2d   :  { %679 = vmatpush.bf16.msrb.mxu3 %v1355_v53  ;;  %v1373_v53 = vld [vmem:[%s1733_s7 + $0x38] sm:$0xff] }
  0x2e   :  { %641 = vmatpush.bf16.msrb.mxu0 %v1330_v54  ;;  %v1372_v54 = vld [vmem:[%s1733_s7 + $0x30] sm:$0xff] }
  0x2f   :  { %654 = vmatpush.bf16.msrb.mxu1 %v1338_v55  ;;  %v1371_v55 = vld [vmem:[%s1733_s7 + $0x28] sm:$0xff] }
  0x30   :  { %667 = vmatpush.bf16.msrb.mxu2 %v1346_v56  ;;  %v1370_v56 = vld [vmem:[%s1733_s7 + $0x20] sm:$0xff] }
  0x31   :  { %680 = vmatpush.bf16.msrb.mxu3 %v1354_v57  ;;  %v1369_v57 = vld [vmem:[%s1733_s7 + $0x18] sm:$0xff] }
  0x32   :  { %642 = vmatpush.bf16.msrb.mxu0 %v1329_v58  ;;  %v1368_v58 = vld [vmem:[%s1733_s7 + $0x10] sm:$0xff] }
  0x33   :  { %655 = vmatpush.bf16.msrb.mxu1 %v1337_v59  ;;  %v1379_v59 = vld [vmem:[%s1729_s4] ss:$0 sm:$0xff] }
  0x34   :  { %668 = vmatpush.bf16.msrb.mxu2 %v1345_v60 }
  0x35   :  { %681 = vmatpush.bf16.msrb.mxu3 %v1353_v61 }
  0x36   :  { %643 = vmatpush.bf16.msrb.mxu0 %v1328_v62 }
  0x37   :  { %656 = vmatpush.bf16.msrb.mxu1 %v1336_v63 }
  0x38   :  { %669 = vmatpush.bf16.msrb.mxu2 %v1344_v0 }
  0x39   :  { %682 = vmatpush.bf16.msrb.mxu3 %v1352_v1  ;;  %v1367_v1 = vld [vmem:[%s1733_s7 + $0x8] sm:$0xff] }
  0x3a   :  { %644 = vmatpush.bf16.msrb.mxu0 %v1327_v2  ;;  %v1366_v2 = vld [vmem:[%s1733_s7] sm:$0xff] }
  0x3b   :  { %657 = vmatpush.bf16.msrb.mxu1 %v1335_v3  ;;  %v1377_v3 = vld [vmem:[%s1735_s9 + $0x18] sm:$0xff] }
  0x3c   :  { %670 = vmatpush.bf16.msrb.mxu2 %v1343_v4  ;;  %v1376_v4 = vld [vmem:[%s1735_s9 + $0x10] sm:$0xff] }
  0x3d   :  { %683 = vmatpush.bf16.msrb.mxu3 %v1351_v5  ;;  %v1375_v5 = vld [vmem:[%s1735_s9 + $0x8] sm:$0xff] }
  0x3e   :  { %645 = vmatpush.bf16.msrb.mxu0 %v1326_v6  ;;  %v1380_v6 = vld [vmem:[%s1732_s6] ss:$0 sm:$0xff] }
  0x3f   :  { %658 = vmatpush.bf16.msrb.mxu1 %v1334_v7 }
  0x40   :  { %671 = vmatpush.bf16.msrb.mxu2 %v1342_v8 }
  0x41   :  { %684 = vmatpush.bf16.msrb.mxu3 %v1350_v9  ;;  %646 = vmatmul.bf16.vlgmr.msrb.gmra.mxu0 %v66_v14 }
  0x42   :  { %659 = vmatmul.bf16.vlgmr.msrb.gmra.mxu1 %v67_v15  ;;  %736 = vmatpush.bf16.msra.mxu0 %v1361_v18 }
  0x43   :  { %672 = vmatmul.bf16.vlgmr.msrb.gmra.mxu2 %v68_v16  ;;  %790 = vmatpush.bf16.msra.mxu1 %v1365_v29 }
  0x44   :  { %685 = vmatmul.bf16.vlgmr.msrb.gmra.mxu3 %v69_v17  ;;  %869 = vmatpush.bf16.msra.mxu2 %v1373_v53 }
  0x45   :  { %927 = vmatpush.bf16.msra.mxu3 %v1377_v3 }
  0x46   :  { %737 = vmatpush.bf16.msra.mxu0 %v1360_v20 }
  0x47   :  { %791 = vmatpush.bf16.msra.mxu1 %v1364_v32 }
  0x48   :  { %870 = vmatpush.bf16.msra.mxu2 %v1372_v54 }
  0x49   :  { %928 = vmatpush.bf16.msra.mxu3 %v1376_v4 }
  0x4a   :  { %738 = vmatpush.bf16.msra.mxu0 %v1359_v22 }
  0x4b   :  { %792 = vmatpush.bf16.msra.mxu1 %v1363_v34 }
  0x4c   :  { %871 = vmatpush.bf16.msra.mxu2 %v1371_v55 }
  0x4d   :  { %929 = vmatpush.bf16.msra.mxu3 %v1375_v5 }
  0x4e   :  { %739 = vmatpush.bf16.msra.mxu0 %v1358_v26 }
  0x4f   :  { %793 = vmatpush.bf16.msra.mxu1 %v1362_v52 }
  0x50   :  { %872 = vmatpush.bf16.msra.mxu2 %v1370_v56 }
  0x51   :  { %930 = vmatpush.bf16.msra.mxu3 %v1374_v12 }
  0x54   :  { %873 = vmatpush.bf16.msra.mxu2 %v1369_v57 }
  0x58   :  { %874 = vmatpush.bf16.msra.mxu2 %v1368_v58 }
  0x5c   :  { %875 = vmatpush.bf16.msra.mxu2 %v1367_v1 }
  0x60   :  { %876 = vmatpush.bf16.msra.mxu2 %v1366_v2 }
  0x9e   :  { %v595_v19 = vpop.f32.mrf.mxu0 }
  0x9f   :  { %v608_v21 = vpop.f32.mrf.mxu1  ;;  %v596_v33 = vadd.f32 %v1378_v28, %v595_v19  ;;  %v1382_v19 = vld [vmem:[%s1736_s10] ss:$0 sm:$0xff] }
  0xa1   :  { %v609_v35 = vadd.f32 %v608_v21, %v596_v33 }
  0xa6   :  { %v621_v23 = vpop.f32.mrf.mxu2  ;;  %v597_v25 = vpop.f32.mrf.mxu0 }
  0xa7   :  { %v634_v24 = vpop.f32.mrf.mxu3  ;;  %v610_v27 = vpop.f32.mrf.mxu1  ;;  %v622_v36 = vadd.f32 %v621_v23, %v609_v35 }
  0xa9   :  { %v635_v37 = vadd.f32 %v634_v24, %v622_v36 }
  0xae   :  { %v623_v30 = vpop.f32.mrf.mxu2 }
  0xaf   :  { %v636_v31 = vpop.f32.mrf.mxu3 }
  0xbe   :  { %v647_v38 = vpop.f32.mrf.mxu0 }
  0xbf   :  { %v660_v39 = vpop.f32.mrf.mxu1  ;;  %v648_v40 = vadd.f32 %v647_v38, %v635_v37 }
  0xc1   :  { %v661_v41 = vadd.f32 %v660_v39, %v648_v40 }
  0xc6   :  { %v673_v42 = vpop.f32.mrf.mxu2  ;;  %v649_v45 = vpop.f32.mrf.mxu0 }
  0xc7   :  { %v686_v43 = vpop.f32.mrf.mxu3  ;;  %v674_v44 = vadd.f32 %v673_v42, %v661_v41  ;;  %v662_v46 = vpop.f32.mrf.mxu1 }
  0xc9   :  { %v687_v47 = vadd.f32 %v686_v43, %v674_v44 }
  0xcb   :  { %v690_v48 = vmax.f32 %v687_v47, 0.0 }
  0xcd   :  { %v691_v49 = vpack.c.bf16 %v690_v48, %v690_v48 }
  0xce   :  { %v675_v50 = vpop.f32.mrf.mxu2 }
  0xcf   :  { %v688_v51 = vpop.f32.mrf.mxu3  ;;  %1227 = vmatmul.msk.bf16.vlgmr.msra.gmra.mxu0 %vm728_vm0, %v691_v49 }
 0x14c   :  { %v741_v60 = vpop.f32.mrf.mxu0 }
 0x14d   :  { %v742_v61 = vadd.f32 %v1379_v59, %v741_v60 }
 0x14f   :  { %v745_v62 = vmax.f32 %v742_v61, 0.0 }
 0x151   :  { %v746_v63 = vpack.c.bf16 %v745_v62, %v745_v62 }
 0x153   :  { %1244 = vmatmul.msk.bf16.vlgmr.msra.gmra.mxu1 %vm728_vm0, %v746_v63 }
 0x154   :  { %v743_v0 = vpop.f32.mrf.mxu0 }
 0x1d0   :  { %v795_v7 = vpop.f32.mrf.mxu1 }
 0x1d1   :  { %v796_v8 = vadd.f32 %v1380_v6, %v795_v7 }
 0x1d3   :  { %v799_v9 = vmax.f32 %v796_v8, 0.0 }
 0x1d5   :  { %v800_v10 = vpack.c.bf16 %v799_v9, %v799_v9 }
 0x1d7   :  { %877 = vmatmul.bf16.vlgmr.msra.gmra.mxu2 %v800_v10 }
 0x1d8   :  { %v797_v11 = vpop.f32.mrf.mxu1 }
 0x25a   :  { %v878_v14 = vpop.f32.mrf.mxu2 }
 0x25b   :  { %v879_v15 = vadd.f32 %v1381_v13, %v878_v14 }
 0x25d   :  { %v882_v16 = vmax.f32 %v879_v15, 0.0 }
 0x25f   :  { %v883_v17 = vpack.c.bf16 %v882_v16, %v882_v16 }
 0x261   :  { %1293 = vmatmul.msk.bf16.vlgmr.msra.gmra.mxu3 %vm728_vm0, %v883_v17 }
 0x262   :  { %v880_v18 = vpop.f32.mrf.mxu2 }
 0x2e4   :  { %v932_v20 = vpop.f32.mrf.mxu3 }
 0x2e5   :  { %v933_v21 = vadd.f32 %v1382_v19, %v932_v20 }
 0x2e7   :  { %v937_v22 = vsel %vm936_vm1, %v933_v21, -inf }
 0x2e8   :  { %938 = vmax.xlane.f32.xlu0 %v937_v22 }
 0x2ec   :  { %v934_v23 = vpop.f32.mrf.mxu3 }
 0x35b   :  { %v939_v24 = vpop.xlane.xlu0 %938 }
 0x35c   :  { %v940_v25 = vsub.f32 %v933_v21, %v939_v24 }
 0x35e   :  { %v941_v26 = vmul.f32 1.442695, %v940_v25 }
 0x360   :  { %1383 = vpow2.f32 %v941_v26 }
 0x366   :  { %v1384_v27 = vpop.eup %1383 }
 0x367   :  { %v943_v28 = vsel %vm936_vm1, %v1384_v27, 0.0 }
 0x368   :  { %944 = vadd.xlane.f32.xlu0 %v943_v28 }
 0x3db   :  { %v945_v29 = vpop.xlane.xlu0 %944 }
 0x3dc   :  { %1385 = vlog2.f32 %v945_v29 }
 0x3e2   :  { %v1386_v30 = vpop.eup %1385 }
 0x3e3   :  { %v947_v31 = vmul.f32 0.6931472, %v1386_v30 }
 0x3e5   :  { %v948_v32 = vsub.f32 %v940_v25, %v947_v31 }
 0x3e7   :  { %v949_v33 = vpack.c.bf16 %v948_v32, %v948_v32 }
 0x3e9   :  { %950 = vst [vmem:[%s1737_s11] sm:$0x1] %v949_v33 }

</bundles_post_ra>
